<compile_context>
chip_gen: v5e
topology: v5e:2x2
jax: 0.10.0
libtpu: 0.0.40
codegen_flags: <defaults>
</compile_context>

<pallas_src>
import jax
import jax.numpy as jnp
from jax import lax
from jax.experimental import pallas as pl
from jax.experimental.pallas import tpu as pltpu


def _round_up(v, m):
    return -(-v // m) * m


def bn_fold(gamma, beta, mean, var, eps=1e-5):
    scale = gamma / jnp.sqrt(var + eps)
    shift = beta - mean * scale
    return scale.astype(jnp.float32), shift.astype(jnp.float32)


# ---------------------------------------------------------------------------
# Stage A: conv1 (1x1x1) + folded BN1 + ReLU     (row-tiled matmul)
# ---------------------------------------------------------------------------
def _conv1_kernel(x_ref, w_ref, b_ref, o_ref):
    # x/w already bf16 in HBM -> no in-kernel cast.
    y = jnp.dot(x_ref[...], w_ref[...], preferred_element_type=jnp.float32)
    o_ref[...] = jnp.maximum(y + b_ref[...], 0.0).astype(o_ref.dtype)


def _stage_a_vmem_bytes(tm, C_pad, m_pad):
    blocks = (tm * C_pad * 2            # x tile (bf16)
              + C_pad * m_pad * 2       # w (bf16)
              + m_pad * 4               # shift (f32)
              + tm * m_pad * 2)         # out tile (bf16)
    need = 2 * blocks                   # double-buffered
    return int(min(need * 2 + (2 << 20), 64 << 20))


def conv1_bn_relu(x2d, w1f, shift1):
    M, C_pad = x2d.shape
    m_pad = w1f.shape[1]
    # Fixed large row tile (85%+ of HBM roofline) + padded tail; no tiny-tile
    # divisor fallback.
    tm = min(512, _round_up(M, 8))
    Mp = _round_up(M, tm)
    if Mp != M:
        x2d = jnp.pad(x2d, ((0, Mp - M), (0, 0)))
    ce = pl.CostEstimate(
        flops=int(2 * Mp * C_pad * m_pad), transcendentals=0,
        bytes_accessed=int(Mp * (2 * C_pad + 2 * m_pad)
                           + 2 * C_pad * m_pad + 4 * m_pad))
    h1 = pl.pallas_call(
        _conv1_kernel,
        out_shape=jax.ShapeDtypeStruct((Mp, m_pad), jnp.bfloat16),
        grid=(Mp // tm,),
        in_specs=[pl.BlockSpec((tm, C_pad), lambda i: (i, 0)),
                  pl.BlockSpec((C_pad, m_pad), lambda i: (0, 0)),
                  pl.BlockSpec((1, m_pad), lambda i: (0, 0))],
        out_specs=pl.BlockSpec((tm, m_pad), lambda i: (i, 0)),
        compiler_params=pltpu.CompilerParams(
            dimension_semantics=("parallel",),
            vmem_limit_bytes=_stage_a_vmem_bytes(tm, C_pad, m_pad)),
        cost_estimate=ce,
    )(x2d, w1f, shift1)
    return h1[:M] if Mp != M else h1


# ---------------------------------------------------------------------------
# Stage B: conv2 (grouped 3x3x3) + BN2 + ReLU + conv3 + BN3 + residual + ReLU
# ---------------------------------------------------------------------------
def _make_conv23_kernel(S, LS, NB, CS):
    def kernel(pfirst_ref, pnew_ref, w2_ref, b2_ref, w3_ref, b3_ref,
               res_ref, o_ref, ring_ref):
        d = pl.program_id(1)
        s0 = d % 2          # ring slot holding padded plane d
        s1 = 1 - s0         # ring slot holding padded plane d+1

        # --- plane ring init (once per batch item) --------------------------
        # Padded depth-plane p lives in ring slot (p % 2).  At step d the ring
        # holds planes d and d+1; pnew_ref supplies plane d+2 (fetched from
        # HBM exactly once per plane).
        @pl.when(d == 0)
        def _():
            ring_ref[0] = jnp.zeros(ring_ref.shape[1:], ring_ref.dtype)  # plane 0 (depth pad)
            ring_ref[1] = pfirst_ref[0, 0]                               # plane 1

        def tap(kd, start, csl):
            # 27 static row-shifted windows of the flattened padded plane.
            if kd == 2:
                return pnew_ref[0, 0, pl.ds(start, LS), csl]
            slot = s0 if kd == 0 else s1
            return ring_ref[slot, pl.ds(start, LS), csl]

        cp = o_ref.shape[-1]
        y = jnp.zeros((LS, cp), jnp.float32)
        # Chunk-major: accumulate the 27 taps of one 128-lane chunk, apply
        # BN2+ReLU, and immediately push that chunk through conv3.  No
        # (LS, m_pad) f32 intermediate is ever materialized.
        for c in range(NB):
            csl = pl.ds(c * CS, CS)
            acc = jnp.zeros((LS, CS), jnp.float32)
            for kd in range(3):
                for kh in range(3):
                    for kw in range(3):
                        t = (kd * 3 + kh) * 3 + kw
                        start = kh * S + kw          # static; kw==0 starts 8-aligned
                        acc = acc + jnp.dot(tap(kd, start, csl), w2_ref[t, c],
                                            preferred_element_type=jnp.float32)
            h2c = jnp.maximum(acc + b2_ref[:, csl], 0.0).astype(jnp.bfloat16)
            y = y + jnp.dot(h2c, w3_ref[csl, :],
                            preferred_element_type=jnp.float32)

        y = y + b3_ref[...] + res_ref[0, 0]          # BN3 shift + residual (f32)
        o_ref[0, 0] = jnp.maximum(y, 0.0).astype(o_ref.dtype)

        # --- roll the ring: plane d+2 -> slot (d % 2), ready for step d+1 ----
        @pl.when(d + 1 < pl.num_programs(1))
        def _():
            ring_ref[s0] = pnew_ref[0, 0]
    return kernel


def _stage_b_vmem_bytes(P_ext, LS, m_pad, C_pad, NB, CS):
    plane = P_ext * m_pad * 2
    blocks = (2 * plane                 # pfirst + pnew operands (bf16)
              + 27 * NB * CS * CS * 2   # w2 (bf16)
              + m_pad * 4 + C_pad * 4   # shifts (f32)
              + m_pad * C_pad * 2       # w3 (bf16)
              + LS * C_pad * 4          # residual (f32)
              + LS * C_pad * 4)         # out (f32)
    need = 2 * blocks                   # double-buffered operands/output
    need += 2 * plane                   # ring scratch
    need += LS * (CS + C_pad) * 4       # register-accumulator spill slack
    return int(min(need * 2 + (2 << 20), 64 << 20))


# ---------------------------------------------------------------------------
# Wrapper: layout plumbing + parameter folding
# ---------------------------------------------------------------------------
def resnext_bottleneck_forward(x, params, cardinality, stride=1):
    """x: (N, Cin, D, H, W) float32 (PyTorch NCDHW). Returns same layout."""
    assert stride == 1  # TODO(synk): stride>1 / downsample branch not implemented.
    N, C, D, H, W = x.shape

    w1, w2, w3 = params["w1"], params["w2"], params["w3"]
    m = w1.shape[0]
    cexp = w3.shape[0]
    assert cexp == C, "downsample=None requires inplanes == planes * expansion"
    assert m % cardinality == 0
    gpc = m // cardinality

    C_pad = _round_up(C, 128)
    m_pad = _round_up(m, 128)
    S = _round_up(W + 2, 8)        # flattened-plane row stride (8-aligned taps)
    LS = H * S                     # output rows per depth slice (incl. junk cols)
    P_ext = (H + 3) * S            # padded plane rows (+1 extra zero row so the
                                   #  kw-shifted taps of junk columns stay in range)

    # conv2 weight chunking: block-diagonal within 128-lane chunks when groups
    # never straddle a chunk boundary, else dense fallback over m_pad.
    if m_pad > 128 and 128 % gpc == 0:
        CS, NB = 128, m_pad // 128
    else:
        CS, NB = m_pad, 1

    # ---- fold BN scales into weights, pad to lane multiples, cast to bf16 --
    s1, b1 = bn_fold(*params["bn1"])
    s2, b2 = bn_fold(*params["bn2"])
    s3, b3 = bn_fold(*params["bn3"])

    w1m = jnp.transpose(w1[:, :, 0, 0, 0], (1, 0)) * s1[None, :]          # (C, m)
    w1f = jnp.pad(w1m, ((0, C_pad - C), (0, m_pad - m))).astype(jnp.bfloat16)
    shift1 = jnp.pad(b1, (0, m_pad - m)).reshape(1, m_pad)

    w2_dense = jnp.zeros((m_pad, m_pad, 3, 3, 3), jnp.float32)            # [out, in, kd, kh, kw]
    for g in range(cardinality):
        w2_dense = w2_dense.at[g * gpc:(g + 1) * gpc, g * gpc:(g + 1) * gpc].set(
            w2[g * gpc:(g + 1) * gpc])
    s2p = jnp.pad(s2, (0, m_pad - m))
    w2_dense = w2_dense * s2p[:, None, None, None, None]
    w2_t = jnp.transpose(w2_dense, (2, 3, 4, 1, 0)).reshape(27, m_pad, m_pad)  # [tap, in, out]
    w2p = jnp.stack([w2_t[:, c * CS:(c + 1) * CS, c * CS:(c + 1) * CS]
                     for c in range(NB)], axis=1).astype(jnp.bfloat16)    # (27, NB, CS, CS)
    shift2 = jnp.pad(b2, (0, m_pad - m)).reshape(1, m_pad)

    w3m = jnp.transpose(w3[:, :, 0, 0, 0], (1, 0)) * s3[None, :]          # (m, C)
    w3f = jnp.pad(w3m, ((0, m_pad - m), (0, C_pad - C))).astype(jnp.bfloat16)
    shift3 = jnp.pad(b3, (0, C_pad - C)).reshape(1, C_pad)

    # ---- layout: NCDHW -> channels-last, channel-padded ---------------------
    x_cl32 = jnp.transpose(x, (0, 2, 3, 4, 1))                            # (N, D, H, W, C)
    if C_pad != C:
        x_cl32 = jnp.pad(x_cl32, ((0, 0),) * 4 + ((0, C_pad - C),))
    x_cl = x_cl32.astype(jnp.bfloat16)                                    # bf16 Stage-A input
    x2d = x_cl.reshape(N * D * H * W, C_pad)

    # residual in exactly the kernel's output-row layout (row stride S), f32
    xres = jnp.pad(x_cl32, ((0, 0), (0, 0), (0, 0), (0, S - W), (0, 0)))
    xres = xres.reshape(N, D, LS, C_pad)

    # ---- stage A: conv1 + bn1 + relu ----------------------------------------
    h1 = conv1_bn_relu(x2d, w1f, shift1)                                  # (M, m_pad) bf16

    # zero-padded depth planes (trailing depth pad only; the leading zero plane
    # is synthesized in-kernel), flattened to (H+3)*S rows per plane.
    h1p = jnp.pad(h1.reshape(N, D, H, W, m_pad),
                  ((0, 0), (0, 1), (1, 2), (1, S - 1 - W), (0, 0)))
    h1p = h1p.reshape(N, D + 1, P_ext, m_pad)

    # ---- stage B: fused conv2 + conv3 + residual -----------------------------
    ce = pl.CostEstimate(
        flops=int(2 * N * D * (27 * NB * LS * CS * CS + LS * m_pad * C_pad)),
        transcendentals=0,
        bytes_accessed=int(N * (D + 1) * P_ext * m_pad * 2
                           + 2 * N * D * LS * C_pad * 4
                           + 27 * NB * CS * CS * 2 + m_pad * C_pad * 2))
    out_planes = pl.pallas_call(
        _make_conv23_kernel(S, LS, NB, CS),
        out_shape=jax.ShapeDtypeStruct((N, D, LS, C_pad), jnp.float32),
        grid=(N, D),
        in_specs=[
            # plane 1 (input depth 0): only consumed at d == 0, re-fetched only
            # when n changes (constant block index across d).
            pl.BlockSpec((1, 1, P_ext, m_pad), lambda n, d: (n, 0, 0, 0)),
            # the one new plane per step (padded plane d+2).
            pl.BlockSpec((1, 1, P_ext, m_pad), lambda n, d: (n, d + 1, 0, 0)),
            pl.BlockSpec((27, NB, CS, CS), lambda n, d: (0, 0, 0, 0)),
            pl.BlockSpec((1, m_pad), lambda n, d: (0, 0)),
            pl.BlockSpec((m_pad, C_pad), lambda n, d: (0, 0)),
            pl.BlockSpec((1, C_pad), lambda n, d: (0, 0)),
            pl.BlockSpec((1, 1, LS, C_pad), lambda n, d: (n, d, 0, 0)),
        ],
        out_specs=pl.BlockSpec((1, 1, LS, C_pad), lambda n, d: (n, d, 0, 0)),
        scratch_shapes=[pltpu.VMEM((2, P_ext, m_pad), jnp.bfloat16)],
        compiler_params=pltpu.CompilerParams(
            # d is sequential (carries the plane ring); n can still megacore-split.
            dimension_semantics=("parallel", "arbitrary"),
            vmem_limit_bytes=_stage_b_vmem_bytes(P_ext, LS, m_pad, C_pad, NB, CS)),
        cost_estimate=ce,
    )(h1p, h1p, w2p, shift2, w3f, shift3, xres)

    # ---- drop the junk (stride-S) columns / padded channels, back to NCDHW ---
    out = out_planes.reshape(N, D, H, S, C_pad)[:, :, :, :W, :C]
    return jnp.transpose(out, (0, 4, 1, 2, 3))


# ---------------------------------------------------------------------------
# Pure-JAX reference (correctness check only)
# ---------------------------------------------------------------------------
def reference_forward(x, params, cardinality, stride=1):
    def conv(inp, w, stride=1, padding="VALID", groups=1):
        return lax.conv_general_dilated(
            inp, w, (stride,) * 3, padding,
            dimension_numbers=("NCDHW", "OIDHW", "NCDHW"),
            feature_group_count=groups)

    def bn(inp, p):
        s, b = bn_fold(*p)
        return inp * s[None, :, None, None, None] + b[None, :, None, None, None]

    out = jax.nn.relu(bn(conv(x, params["w1"]), params["bn1"]))
    out = conv(out, params["w2"], stride=stride, padding=[(1, 1)] * 3,
               groups=cardinality)
    out = jax.nn.relu(bn(out, params["bn2"]))
    out = bn(conv(out, params["w3"]), params["bn3"])
    return jax.nn.relu(out + x)


# ---------------------------------------------------------------------------
if __name__ == "__main__":
    key = jax.random.PRNGKey(0)
    N, D, H, W = 2, 4, 8, 8
    planes, cardinality, expansion = 64, 4, 2
    mid = cardinality * (planes // 32)      # 8
    inplanes = planes * expansion           # 128 (== output channels -> identity residual)

    ks = jax.random.split(key, 8)
    x = jax.random.normal(ks[0], (N, inplanes, D, H, W), jnp.float32)

    def bn_params(k, c):
        k1, k2, k3, k4 = jax.random.split(k, 4)
        gamma = 1.0 + 0.1 * jax.random.normal(k1, (c,), jnp.float32)
        beta = 0.1 * jax.random.normal(k2, (c,), jnp.float32)
        mean = 0.1 * jax.random.normal(k3, (c,), jnp.float32)
        var = jnp.abs(1.0 + 0.1 * jax.random.normal(k4, (c,), jnp.float32))
        return (gamma, beta, mean, var)

    params = {
        "w1": 0.05 * jax.random.normal(ks[1], (mid, inplanes, 1, 1, 1), jnp.float32),
        "bn1": bn_params(ks[2], mid),
        "w2": 0.05 * jax.random.normal(ks[3], (mid, mid // cardinality, 3, 3, 3), jnp.float32),
        "bn2": bn_params(ks[4], mid),
        "w3": 0.05 * jax.random.normal(ks[5], (planes * expansion, mid, 1, 1, 1), jnp.float32),
        "bn3": bn_params(ks[6], planes * expansion),
    }

    out = resnext_bottleneck_forward(x, params, cardinality, stride=1)
    out = jax.block_until_ready(out)

    ref = reference_forward(x, params, cardinality, stride=1)
    assert out.shape == ref.shape == (N, planes * expansion, D, H, W)
    # bf16 weights/activations on the MXU give ~1e-2 abs error at these scales;
    # the residual add and final output stay f32.
    max_err = float(jnp.max(jnp.abs(out - ref)))
    if max_err > 2e-2:
        raise AssertionError(f"kernel/reference mismatch: max abs err {max_err}")
    print("KERNEL_OK")
</pallas_src>

<mosaic_0001>
module attributes {stable_mosaic.version = 11 : i64} {
  func.func @_conv1_kernel(%arg0: i32, %arg1: memref<512x128xbf16, #tpu.memory_space<vmem>>, %arg2: memref<128x128xbf16, #tpu.memory_space<vmem>>, %arg3: memref<1x128xf32, #tpu.memory_space<vmem>>, %arg4: memref<512x128xbf16, #tpu.memory_space<vmem>>) attributes {dimension_semantics = [#tpu.dimension_semantics<parallel>], iteration_bounds = array<i64: 1>, scalar_prefetch = 0 : i64, scratch_operands = 0 : i64, tpu.core_type = #tpu.core_type<tc>, window_params = [{transform_indices = @transform_0, window_bounds = array<i64: 512, 128>}, {pipeline_mode = #tpu.pipeline_mode<synchronous>, transform_indices = @transform_1, window_bounds = array<i64: 128, 128>}, {pipeline_mode = #tpu.pipeline_mode<synchronous>, transform_indices = @transform_2, window_bounds = array<i64: 1, 128>}, {transform_indices = @transform_3, window_bounds = array<i64: 512, 128>}]} {
    %c0 = arith.constant 0 : index
    %c0_0 = arith.constant 0 : index
    %0 = vector.load %arg1[%c0, %c0_0] : memref<512x128xbf16, #tpu.memory_space<vmem>>, vector<512x128xbf16>
    %c0_1 = arith.constant 0 : index
    %c0_2 = arith.constant 0 : index
    %1 = vector.load %arg2[%c0_1, %c0_2] : memref<128x128xbf16, #tpu.memory_space<vmem>>, vector<128x128xbf16>
    %cst = arith.constant dense<0.000000e+00> : vector<512x128xf32>
    %2 = tpu.matmul %0, %1, %cst {dimension_numbers = #tpu.dot_dimension_numbers<[1], [0], [0], [1], [0, 0, 1, 1], [], []>} : vector<512x128xbf16>, vector<128x128xbf16>, vector<512x128xf32> -> vector<512x128xf32>
    %c0_3 = arith.constant 0 : index
    %c0_4 = arith.constant 0 : index
    %3 = vector.load %arg3[%c0_3, %c0_4] : memref<1x128xf32, #tpu.memory_space<vmem>>, vector<1x128xf32>
    %4 = vector.broadcast %3 : vector<1x128xf32> to vector<512x128xf32>
    %5 = arith.addf %2, %4 : vector<512x128xf32>
    %cst_5 = arith.constant 0.000000e+00 : f32
    %6 = vector.broadcast %cst_5 : f32 to vector<512x128xf32>
    %7 = arith.maximumf %5, %6 : vector<512x128xf32>
    %8 = arith.truncf %7 : vector<512x128xf32> to vector<512x128xbf16>
    %c0_6 = arith.constant 0 : index
    %c0_7 = arith.constant 0 : index
    %9 = vector.load %arg4[%c0_6, %c0_7] : memref<512x128xbf16, #tpu.memory_space<vmem>>, vector<512x128xbf16>
    tpu.vector_store %arg4[%c0_6, %c0_7], %8 {strides = array<i32>} : memref<512x128xbf16, #tpu.memory_space<vmem>>, vector<512x128xbf16>,
    return
  }
  func.func @transform_0(%arg0: i32) -> (i32, i32) {
    %c0_i32 = arith.constant 0 : i32
    %c0_i32_0 = arith.constant 0 : i32
    return %arg0, %c0_i32 : i32, i32
  }
  func.func @transform_1(%arg0: i32) -> (i32, i32) {
    %c0_i32 = arith.constant 0 : i32
    %c0_i32_0 = arith.constant 0 : i32
    %c0_i32_1 = arith.constant 0 : i32
    return %c0_i32, %c0_i32_0 : i32, i32
  }
  func.func @transform_2(%arg0: i32) -> (i32, i32) {
    %c0_i32 = arith.constant 0 : i32
    %c0_i32_0 = arith.constant 0 : i32
    %c0_i32_1 = arith.constant 0 : i32
    return %c0_i32, %c0_i32_0 : i32, i32
  }
  func.func @transform_3(%arg0: i32) -> (i32, i32) {
    %c0_i32 = arith.constant 0 : i32
    %c0_i32_0 = arith.constant 0 : i32
    return %arg0, %c0_i32 : i32, i32
  }
}

</mosaic_0001>

<bundles_post_ra>
// kernel: tpu_custom_call.1
= control target key start
LH: loop header
LB: loop body
LE: loop exit
PB: predicated region body
PF: predicated region fallthrough
CT: control target
= control target key end

     0   :  { %8 = vsyncpa [#allocation3], 0  ;;  %s1363_s0 = inlined_call_operand.hbm [shape: bf16[512,128], index: 0, kind: input, shape index: {}]   ;;  %s1364_s1 = inlined_call_operand.hbm [shape: bf16[128,128], index: 1, kind: input, shape index: {}]   ;;  %s1365_s2 = inlined_call_operand.vmem [shape: f32[1,128], index: 2, kind: input, shape index: {}]   ;;  %s1366_s3 = inlined_call_operand.hbm [shape: bf16[512,128], index: 3, kind: output, shape index: {}]  }
   0x1   :  { %9 = vsyncpa [#allocation6], 0 }
   0x2   :  { %10 = vsyncpa [#allocation4], 0  ;;  %s15_s14 = sshll.u32 %s1363_s0, 4  ;;  %s1251_s15 = smov [#allocation2]   ;;  %s16_s14 = int_to_ptr.hbm [resolvable:$true] %s15_s14 }
   0x3   :  { %s17_s16 = sshll.u32 %s1251_s15, 4  ;;  %s28_s19 = sshll.u32 %s1364_s1, 4  ;;  %s18_s16 = int_to_ptr.vmem [resolvable:$true] %s17_s16  ;;  %s29_s19 = int_to_ptr.hbm [resolvable:$true] %s28_s19 }
   0x4   :  { %s1252_s20 = smov 64   ;;  %s1253_s21 = smov 4  }
   0x5   :  { %23 = dma.hbm_to_vmem [thread:$0]  %s16_s14, 4096, %s18_s16, [#allocation3], %s1252_s20, %s1252_s20, %s1253_s21  }
   0x6   :  { %s1254_s22 = smov [#allocation5]  }
   0x7   :  { %s30_s23 = sshll.u32 %s1254_s22, 4  ;;  %s31_s23 = int_to_ptr.vmem [resolvable:$true] %s30_s23 }
   0x8   :  { %36 = dma.hbm_to_vmem [thread:$0]  %s29_s19, 1024, %s31_s23, [#allocation6], %s1252_s20, %s1252_s20, %s1253_s21  }
   0x9   :  { %1245 = dma.done.wait [#allocation3], 4096  }
   0xa   :  { %1246 = vsyncadd [#allocation3], 4294963200 }
   0xb   :  { %1247 = dma.done.wait [#allocation6], 1024  }
   0xc   :  { %1248 = vsyncadd [#allocation6], 4294966272  ;;  %v951_v0 = vld [vmem:[#allocation5 + $0x38] sm:$0xff]  ;;  %v950_v1 = vld [vmem:[#allocation5 + $0x30] sm:$0xff]  ;;  %s738_s27 = sshll.u32 %s1366_s3, 4  ;;  %s739_s27 = int_to_ptr.hbm [resolvable:$true] %s738_s27 }
   0xd   :  { %371 = vmatpush.bf16.msra.mxu0 %v951_v0  ;;  %1143 = vmatpush.bf16.msra.mxu1 %v951_v0  ;;  %v949_v2 = vld [vmem:[#allocation5 + $0x28] sm:$0xff]  ;;  %v948_v3 = vld [vmem:[#allocation5 + $0x20] sm:$0xff]  ;;  %v947_v4 = vld [vmem:[#allocation5 + $0x18] sm:$0xff] }
   0xe   :  { %1144 = vmatpush.bf16.msra.mxu2 %v951_v0  ;;  %1145 = vmatpush.bf16.msra.mxu3 %v951_v0  ;;  %v946_v5 = vld [vmem:[#allocation5 + $0x10] sm:$0xff]  ;;  %v945_v6 = vld [vmem:[#allocation5 + $0x8] sm:$0xff]  ;;  %v944_v7 = vld [vmem:[#allocation5] sm:$0xff] }
   0xf   :  { %v912_v8 = vld [vmem:[#allocation2] sm:$0xff]  ;;  %v913_v12 = vld [vmem:[#allocation2 + $0x8] sm:$0xff]  ;;  %v914_v16 = vld [vmem:[#allocation2 + $0x10] sm:$0xff] }
  0x10   :  { %v920_v9 = vld [vmem:[#allocation2 + $0x40] sm:$0xff]  ;;  %v921_v13 = vld [vmem:[#allocation2 + $0x48] sm:$0xff]  ;;  %v922_v17 = vld [vmem:[#allocation2 + $0x50] sm:$0xff] }
  0x11   :  { %372 = vmatpush.bf16.msra.mxu0 %v950_v1  ;;  %1146 = vmatpush.bf16.msra.mxu1 %v950_v1  ;;  %v928_v10 = vld [vmem:[#allocation2 + $0x80] sm:$0xff]  ;;  %v929_v14 = vld [vmem:[#allocation2 + $0x88] sm:$0xff]  ;;  %v930_v18 = vld [vmem:[#allocation2 + $0x90] sm:$0xff] }
  0x12   :  { %1147 = vmatpush.bf16.msra.mxu2 %v950_v1  ;;  %1148 = vmatpush.bf16.msra.mxu3 %v950_v1  ;;  %v936_v11 = vld [vmem:[#allocation2 + $0xc0] sm:$0xff]  ;;  %v937_v15 = vld [vmem:[#allocation2 + $0xc8] sm:$0xff]  ;;  %v938_v19 = vld [vmem:[#allocation2 + $0xd0] sm:$0xff] }
  0x13   :  { %v915_v20 = vld [vmem:[#allocation2 + $0x18] sm:$0xff]  ;;  %v916_v24 = vld [vmem:[#allocation2 + $0x20] sm:$0xff]  ;;  %v917_v28 = vld [vmem:[#allocation2 + $0x28] sm:$0xff] }
  0x14   :  { %v923_v21 = vld [vmem:[#allocation2 + $0x58] sm:$0xff]  ;;  %v924_v25 = vld [vmem:[#allocation2 + $0x60] sm:$0xff]  ;;  %v925_v29 = vld [vmem:[#allocation2 + $0x68] sm:$0xff] }
  0x15   :  { %373 = vmatpush.bf16.msra.mxu0 %v949_v2  ;;  %1149 = vmatpush.bf16.msra.mxu1 %v949_v2  ;;  %v931_v22 = vld [vmem:[#allocation2 + $0x98] sm:$0xff]  ;;  %v932_v26 = vld [vmem:[#allocation2 + $0xa0] sm:$0xff]  ;;  %v933_v30 = vld [vmem:[#allocation2 + $0xa8] sm:$0xff] }
  0x16   :  { %1150 = vmatpush.bf16.msra.mxu2 %v949_v2  ;;  %1151 = vmatpush.bf16.msra.mxu3 %v949_v2  ;;  %v939_v23 = vld [vmem:[#allocation2 + $0xd8] sm:$0xff]  ;;  %v940_v27 = vld [vmem:[#allocation2 + $0xe0] sm:$0xff]  ;;  %v941_v31 = vld [vmem:[#allocation2 + $0xe8] sm:$0xff] }
  0x17   :  { %v918_v32 = vld [vmem:[#allocation2 + $0x30] sm:$0xff]  ;;  %v919_v36 = vld [vmem:[#allocation2 + $0x38] sm:$0xff]  ;;  %v1291_v42 = vld [vmem:[%s1365_s2] ss:$0 sm:$0xff]  ;;  %s1255_s2 = smov [#allocation7]  }
  0x18   :  { %v926_v33 = vld [vmem:[#allocation2 + $0x70] sm:$0xff]  ;;  %v927_v37 = vld [vmem:[#allocation2 + $0x78] sm:$0xff]  ;;  %s736_s24 = sshll.u32 %s1255_s2, 4  ;;  %s737_s24 = int_to_ptr.vmem [resolvable:$true] %s736_s24 }
  0x19   :  { %374 = vmatpush.bf16.msra.mxu0 %v948_v3  ;;  %1152 = vmatpush.bf16.msra.mxu1 %v948_v3  ;;  %v934_v34 = vld [vmem:[#allocation2 + $0xb0] sm:$0xff]  ;;  %v935_v38 = vld [vmem:[#allocation2 + $0xb8] sm:$0xff] }
  0x1a   :  { %1153 = vmatpush.bf16.msra.mxu2 %v948_v3  ;;  %1154 = vmatpush.bf16.msra.mxu3 %v948_v3  ;;  %v942_v35 = vld [vmem:[#allocation2 + $0xf0] sm:$0xff]  ;;  %v943_v39 = vld [vmem:[#allocation2 + $0xf8] sm:$0xff] }
  0x1d   :  { %375 = vmatpush.bf16.msra.mxu0 %v947_v4  ;;  %1155 = vmatpush.bf16.msra.mxu1 %v947_v4 }
  0x1e   :  { %1156 = vmatpush.bf16.msra.mxu2 %v947_v4  ;;  %1157 = vmatpush.bf16.msra.mxu3 %v947_v4 }
  0x21   :  { %376 = vmatpush.bf16.msra.mxu0 %v946_v5  ;;  %1158 = vmatpush.bf16.msra.mxu1 %v946_v5 }
  0x22   :  { %1159 = vmatpush.bf16.msra.mxu2 %v946_v5  ;;  %1160 = vmatpush.bf16.msra.mxu3 %v946_v5 }
  0x25   :  { %377 = vmatpush.bf16.msra.mxu0 %v945_v6  ;;  %1161 = vmatpush.bf16.msra.mxu1 %v945_v6 }
  0x26   :  { %1162 = vmatpush.bf16.msra.mxu2 %v945_v6  ;;  %1163 = vmatpush.bf16.msra.mxu3 %v945_v6 }
  0x29   :  { %378 = vmatpush.bf16.msra.mxu0 %v944_v7  ;;  %1164 = vmatpush.bf16.msra.mxu1 %v944_v7 }
  0x2a   :  { %1165 = vmatpush.bf16.msra.mxu2 %v944_v7  ;;  %1166 = vmatpush.bf16.msra.mxu3 %v944_v7 }
  0x2c   :  { %379 = vmatmul.bf16.vlgmr.msra.gmra.mxu0 %v912_v8  ;;  %419 = vmatmul.bf16.vlgmr.msra.gmra.mxu1 %v920_v9 }
  0x2d   :  { %459 = vmatmul.bf16.vlgmr.msra.gmra.mxu2 %v928_v10  ;;  %499 = vmatmul.bf16.vlgmr.msra.gmra.mxu3 %v936_v11 }
  0x3c   :  { %384 = vmatmul.bf16.gmra.mxu0 %v913_v12  ;;  %424 = vmatmul.bf16.gmra.mxu1 %v921_v13 }
  0x3d   :  { %464 = vmatmul.bf16.gmra.mxu2 %v929_v14  ;;  %504 = vmatmul.bf16.gmra.mxu3 %v937_v15 }
  0x4c   :  { %389 = vmatmul.bf16.gmra.mxu0 %v914_v16  ;;  %429 = vmatmul.bf16.gmra.mxu1 %v922_v17 }
  0x4d   :  { %469 = vmatmul.bf16.gmra.mxu2 %v930_v18  ;;  %509 = vmatmul.bf16.gmra.mxu3 %v938_v19 }
  0x5c   :  { %394 = vmatmul.bf16.gmra.mxu0 %v915_v20  ;;  %434 = vmatmul.bf16.gmra.mxu1 %v923_v21 }
  0x5d   :  { %474 = vmatmul.bf16.gmra.mxu2 %v931_v22  ;;  %514 = vmatmul.bf16.gmra.mxu3 %v939_v23 }
  0x6c   :  { %399 = vmatmul.bf16.gmra.mxu0 %v916_v24  ;;  %439 = vmatmul.bf16.gmra.mxu1 %v924_v25 }
  0x6d   :  { %479 = vmatmul.bf16.gmra.mxu2 %v932_v26  ;;  %519 = vmatmul.bf16.gmra.mxu3 %v940_v27 }
  0x7c   :  { %404 = vmatmul.bf16.gmra.mxu0 %v917_v28  ;;  %444 = vmatmul.bf16.gmra.mxu1 %v925_v29 }
  0x7d   :  { %484 = vmatmul.bf16.gmra.mxu2 %v933_v30  ;;  %524 = vmatmul.bf16.gmra.mxu3 %v941_v31 }
  0x8c   :  { %409 = vmatmul.bf16.gmra.mxu0 %v918_v32  ;;  %449 = vmatmul.bf16.gmra.mxu1 %v926_v33 }
  0x8d   :  { %489 = vmatmul.bf16.gmra.mxu2 %v934_v34  ;;  %529 = vmatmul.bf16.gmra.mxu3 %v942_v35 }
  0x9c   :  { %414 = vmatmul.bf16.gmra.mxu0 %v919_v36  ;;  %454 = vmatmul.bf16.gmra.mxu1 %v927_v37 }
  0x9d   :  { %494 = vmatmul.bf16.gmra.mxu2 %v935_v38  ;;  %534 = vmatmul.bf16.gmra.mxu3 %v943_v39 }
  0xa9   :  { %v380_v40 = vpop.f32.mrf.mxu0  ;;  %v420_v41 = vpop.f32.mrf.mxu1 }
  0xaa   :  { %v381_v43 = vadd.f32 %v1291_v42, %v380_v40  ;;  %v421_v44 = vadd.f32 %v1291_v42, %v420_v41 }
  0xac   :  { %v540_v51 = vmax.f32 %v381_v43, 0.0  ;;  %v556_v52 = vmax.f32 %v421_v44, 0.0 }
  0xb0   :  { %v460_v45 = vpop.f32.mrf.mxu2  ;;  %v500_v46 = vpop.f32.mrf.mxu3 }
  0xb1   :  { %v382_v47 = vpop.f32.mrf.mxu0  ;;  %v422_v48 = vpop.f32.mrf.mxu1  ;;  %v461_v57 = vadd.f32 %v1291_v42, %v460_v45  ;;  %v501_v58 = vadd.f32 %v1291_v42, %v500_v46 }
  0xb2   :  { %v383_v49 = vadd.f32 %v1291_v42, %v382_v47  ;;  %v423_v50 = vadd.f32 %v1291_v42, %v422_v48 }
  0xb3   :  { %v572_v1 = vmax.f32 %v461_v57, 0.0  ;;  %v588_v2 = vmax.f32 %v501_v58, 0.0 }
  0xb4   :  { %v541_v53 = vmax.f32 %v383_v49, 0.0  ;;  %v557_v54 = vmax.f32 %v423_v50, 0.0 }
  0xb6   :  { %v955_v55 = vpack.c.bf16 %v541_v53, %v540_v51  ;;  %v995_v56 = vpack.c.bf16 %v557_v54, %v556_v52 }
  0xb8   :  { %956 = vst [vmem:[#allocation7] sm:$0xff] %v955_v55   ;;  %v462_v59 = vpop.f32.mrf.mxu2  ;;  %v502_v60 = vpop.f32.mrf.mxu3 }
  0xb9   :  { %1119 = vst [vmem:[#allocation7 + $0x40] sm:$0xff] %v995_v56   ;;  %v463_v61 = vadd.f32 %v1291_v42, %v462_v59  ;;  %v503_v62 = vadd.f32 %v1291_v42, %v502_v60  ;;  %v385_v63 = vpop.f32.mrf.mxu0  ;;  %v425_v0 = vpop.f32.mrf.mxu1 }
  0xba   :  { %v386_v7 = vadd.f32 %v1291_v42, %v385_v63  ;;  %v426_v8 = vadd.f32 %v1291_v42, %v425_v0 }
  0xbb   :  { %v573_v3 = vmax.f32 %v463_v61, 0.0  ;;  %v589_v4 = vmax.f32 %v503_v62, 0.0 }
  0xbc   :  { %v542_v15 = vmax.f32 %v386_v7, 0.0  ;;  %v558_v16 = vmax.f32 %v426_v8, 0.0 }
  0xbd   :  { %v1035_v5 = vpack.c.bf16 %v573_v3, %v572_v1  ;;  %v1075_v6 = vpack.c.bf16 %v589_v4, %v588_v2 }
  0xbf   :  { %1127 = vst [vmem:[#allocation7 + $0x80] sm:$0xff] %v1035_v5  }
  0xc0   :  { %1135 = vst [vmem:[#allocation7 + $0xc0] sm:$0xff] %v1075_v6   ;;  %v465_v9 = vpop.f32.mrf.mxu2  ;;  %v505_v10 = vpop.f32.mrf.mxu3 }
  0xc1   :  { %v387_v11 = vpop.f32.mrf.mxu0  ;;  %v427_v12 = vpop.f32.mrf.mxu1  ;;  %v466_v21 = vadd.f32 %v1291_v42, %v465_v9  ;;  %v506_v22 = vadd.f32 %v1291_v42, %v505_v10 }
  0xc2   :  { %v388_v13 = vadd.f32 %v1291_v42, %v387_v11  ;;  %v428_v14 = vadd.f32 %v1291_v42, %v427_v12 }
  0xc3   :  { %v574_v29 = vmax.f32 %v466_v21, 0.0  ;;  %v590_v30 = vmax.f32 %v506_v22, 0.0 }
  0xc4   :  { %v543_v17 = vmax.f32 %v388_v13, 0.0  ;;  %v559_v18 = vmax.f32 %v428_v14, 0.0 }
  0xc6   :  { %v960_v19 = vpack.c.bf16 %v543_v17, %v542_v15  ;;  %v1000_v20 = vpack.c.bf16 %v559_v18, %v558_v16 }
  0xc8   :  { %1112 = vst [vmem:[#allocation7 + $0x8] sm:$0xff] %v960_v19   ;;  %v467_v23 = vpop.f32.mrf.mxu2  ;;  %v507_v24 = vpop.f32.mrf.mxu3 }
  0xc9   :  { %1120 = vst [vmem:[#allocation7 + $0x48] sm:$0xff] %v1000_v20   ;;  %v468_v25 = vadd.f32 %v1291_v42, %v467_v23  ;;  %v508_v26 = vadd.f32 %v1291_v42, %v507_v24  ;;  %v390_v27 = vpop.f32.mrf.mxu0  ;;  %v430_v28 = vpop.f32.mrf.mxu1 }
  0xca   :  { %v391_v35 = vadd.f32 %v1291_v42, %v390_v27  ;;  %v431_v36 = vadd.f32 %v1291_v42, %v430_v28 }
  0xcb   :  { %v575_v31 = vmax.f32 %v468_v25, 0.0  ;;  %v591_v32 = vmax.f32 %v508_v26, 0.0 }
  0xcc   :  { %v544_v44 = vmax.f32 %v391_v35, 0.0  ;;  %v560_v45 = vmax.f32 %v431_v36, 0.0 }
  0xcd   :  { %v1040_v33 = vpack.c.bf16 %v575_v31, %v574_v29  ;;  %v1080_v34 = vpack.c.bf16 %v591_v32, %v590_v30 }
  0xcf   :  { %1128 = vst [vmem:[#allocation7 + $0x88] sm:$0xff] %v1040_v33  }
  0xd0   :  { %1136 = vst [vmem:[#allocation7 + $0xc8] sm:$0xff] %v1080_v34   ;;  %v470_v37 = vpop.f32.mrf.mxu2  ;;  %v510_v38 = vpop.f32.mrf.mxu3 }
  0xd1   :  { %v392_v39 = vpop.f32.mrf.mxu0  ;;  %v432_v40 = vpop.f32.mrf.mxu1  ;;  %v471_v50 = vadd.f32 %v1291_v42, %v470_v37  ;;  %v511_v51 = vadd.f32 %v1291_v42, %v510_v38 }
  0xd2   :  { %v393_v41 = vadd.f32 %v1291_v42, %v392_v39  ;;  %v433_v43 = vadd.f32 %v1291_v42, %v432_v40 }
  0xd3   :  { %v576_v58 = vmax.f32 %v471_v50, 0.0  ;;  %v592_v59 = vmax.f32 %v511_v51, 0.0 }
  0xd4   :  { %v545_v46 = vmax.f32 %v393_v41, 0.0  ;;  %v561_v47 = vmax.f32 %v433_v43, 0.0 }
  0xd6   :  { %v965_v48 = vpack.c.bf16 %v545_v46, %v544_v44  ;;  %v1005_v49 = vpack.c.bf16 %v561_v47, %v560_v45 }
  0xd8   :  { %1113 = vst [vmem:[#allocation7 + $0x10] sm:$0xff] %v965_v48   ;;  %v472_v52 = vpop.f32.mrf.mxu2  ;;  %v512_v53 = vpop.f32.mrf.mxu3 }
  0xd9   :  { %1121 = vst [vmem:[#allocation7 + $0x50] sm:$0xff] %v1005_v49   ;;  %v473_v54 = vadd.f32 %v1291_v42, %v472_v52  ;;  %v513_v55 = vadd.f32 %v1291_v42, %v512_v53  ;;  %v395_v56 = vpop.f32.mrf.mxu0  ;;  %v435_v57 = vpop.f32.mrf.mxu1 }
  0xda   :  { %v396_v0 = vadd.f32 %v1291_v42, %v395_v56  ;;  %v436_v1 = vadd.f32 %v1291_v42, %v435_v57 }
  0xdb   :  { %v577_v60 = vmax.f32 %v473_v54, 0.0  ;;  %v593_v61 = vmax.f32 %v513_v55, 0.0 }
  0xdc   :  { %v546_v8 = vmax.f32 %v396_v0, 0.0  ;;  %v562_v9 = vmax.f32 %v436_v1, 0.0 }
  0xdd   :  { %v1045_v62 = vpack.c.bf16 %v577_v60, %v576_v58  ;;  %v1085_v63 = vpack.c.bf16 %v593_v61, %v592_v59 }
  0xdf   :  { %1129 = vst [vmem:[#allocation7 + $0x90] sm:$0xff] %v1045_v62  }
  0xe0   :  { %1137 = vst [vmem:[#allocation7 + $0xd0] sm:$0xff] %v1085_v63   ;;  %v475_v2 = vpop.f32.mrf.mxu2  ;;  %v515_v3 = vpop.f32.mrf.mxu3 }
  0xe1   :  { %v397_v4 = vpop.f32.mrf.mxu0  ;;  %v437_v5 = vpop.f32.mrf.mxu1  ;;  %v476_v14 = vadd.f32 %v1291_v42, %v475_v2  ;;  %v516_v15 = vadd.f32 %v1291_v42, %v515_v3 }
  0xe2   :  { %v398_v6 = vadd.f32 %v1291_v42, %v397_v4  ;;  %v438_v7 = vadd.f32 %v1291_v42, %v437_v5 }
  0xe3   :  { %v578_v22 = vmax.f32 %v476_v14, 0.0  ;;  %v594_v23 = vmax.f32 %v516_v15, 0.0 }
  0xe4   :  { %v547_v10 = vmax.f32 %v398_v6, 0.0  ;;  %v563_v11 = vmax.f32 %v438_v7, 0.0 }
  0xe6   :  { %v970_v12 = vpack.c.bf16 %v547_v10, %v546_v8  ;;  %v1010_v13 = vpack.c.bf16 %v563_v11, %v562_v9 }
  0xe8   :  { %1114 = vst [vmem:[#allocation7 + $0x18] sm:$0xff] %v970_v12   ;;  %v477_v16 = vpop.f32.mrf.mxu2  ;;  %v517_v17 = vpop.f32.mrf.mxu3 }
  0xe9   :  { %1122 = vst [vmem:[#allocation7 + $0x58] sm:$0xff] %v1010_v13   ;;  %v478_v18 = vadd.f32 %v1291_v42, %v477_v16  ;;  %v518_v19 = vadd.f32 %v1291_v42, %v517_v17  ;;  %v400_v20 = vpop.f32.mrf.mxu0  ;;  %v440_v21 = vpop.f32.mrf.mxu1 }
  0xea   :  { %v401_v28 = vadd.f32 %v1291_v42, %v400_v20  ;;  %v441_v29 = vadd.f32 %v1291_v42, %v440_v21 }
  0xeb   :  { %v579_v24 = vmax.f32 %v478_v18, 0.0  ;;  %v595_v25 = vmax.f32 %v518_v19, 0.0 }
  0xec   :  { %v548_v36 = vmax.f32 %v401_v28, 0.0  ;;  %v564_v37 = vmax.f32 %v441_v29, 0.0 }
  0xed   :  { %v1050_v26 = vpack.c.bf16 %v579_v24, %v578_v22  ;;  %v1090_v27 = vpack.c.bf16 %v595_v25, %v594_v23 }
  0xef   :  { %1130 = vst [vmem:[#allocation7 + $0x98] sm:$0xff] %v1050_v26  }
  0xf0   :  { %1138 = vst [vmem:[#allocation7 + $0xd8] sm:$0xff] %v1090_v27   ;;  %v480_v30 = vpop.f32.mrf.mxu2  ;;  %v520_v31 = vpop.f32.mrf.mxu3 }
  0xf1   :  { %v402_v32 = vpop.f32.mrf.mxu0  ;;  %v442_v33 = vpop.f32.mrf.mxu1  ;;  %v481_v43 = vadd.f32 %v1291_v42, %v480_v30  ;;  %v521_v44 = vadd.f32 %v1291_v42, %v520_v31 }
  0xf2   :  { %v403_v34 = vadd.f32 %v1291_v42, %v402_v32  ;;  %v443_v35 = vadd.f32 %v1291_v42, %v442_v33 }
  0xf3   :  { %v580_v51 = vmax.f32 %v481_v43, 0.0  ;;  %v596_v52 = vmax.f32 %v521_v44, 0.0 }
  0xf4   :  { %v549_v38 = vmax.f32 %v403_v34, 0.0  ;;  %v565_v39 = vmax.f32 %v443_v35, 0.0 }
  0xf6   :  { %v975_v40 = vpack.c.bf16 %v549_v38, %v548_v36  ;;  %v1015_v41 = vpack.c.bf16 %v565_v39, %v564_v37 }
  0xf8   :  { %1115 = vst [vmem:[#allocation7 + $0x20] sm:$0xff] %v975_v40   ;;  %v482_v45 = vpop.f32.mrf.mxu2  ;;  %v522_v46 = vpop.f32.mrf.mxu3 }
  0xf9   :  { %1123 = vst [vmem:[#allocation7 + $0x60] sm:$0xff] %v1015_v41   ;;  %v483_v47 = vadd.f32 %v1291_v42, %v482_v45  ;;  %v523_v48 = vadd.f32 %v1291_v42, %v522_v46  ;;  %v405_v49 = vpop.f32.mrf.mxu0  ;;  %v445_v50 = vpop.f32.mrf.mxu1 }
  0xfa   :  { %v406_v57 = vadd.f32 %v1291_v42, %v405_v49  ;;  %v446_v58 = vadd.f32 %v1291_v42, %v445_v50 }
  0xfb   :  { %v581_v53 = vmax.f32 %v483_v47, 0.0  ;;  %v597_v54 = vmax.f32 %v523_v48, 0.0 }
  0xfc   :  { %v550_v1 = vmax.f32 %v406_v57, 0.0  ;;  %v566_v2 = vmax.f32 %v446_v58, 0.0 }
  0xfd   :  { %v1055_v55 = vpack.c.bf16 %v581_v53, %v580_v51  ;;  %v1095_v56 = vpack.c.bf16 %v597_v54, %v596_v52 }
  0xff   :  { %1131 = vst [vmem:[#allocation7 + $0xa0] sm:$0xff] %v1055_v55  }
 0x100   :  { %1139 = vst [vmem:[#allocation7 + $0xe0] sm:$0xff] %v1095_v56   ;;  %v485_v59 = vpop.f32.mrf.mxu2  ;;  %v525_v60 = vpop.f32.mrf.mxu3 }
 0x101   :  { %v407_v61 = vpop.f32.mrf.mxu0  ;;  %v447_v62 = vpop.f32.mrf.mxu1  ;;  %v486_v7 = vadd.f32 %v1291_v42, %v485_v59  ;;  %v526_v8 = vadd.f32 %v1291_v42, %v525_v60 }
 0x102   :  { %v408_v63 = vadd.f32 %v1291_v42, %v407_v61  ;;  %v448_v0 = vadd.f32 %v1291_v42, %v447_v62 }
 0x103   :  { %v582_v15 = vmax.f32 %v486_v7, 0.0  ;;  %v598_v16 = vmax.f32 %v526_v8, 0.0 }
 0x104   :  { %v551_v3 = vmax.f32 %v408_v63, 0.0  ;;  %v567_v4 = vmax.f32 %v448_v0, 0.0 }
 0x106   :  { %v980_v5 = vpack.c.bf16 %v551_v3, %v550_v1  ;;  %v1020_v6 = vpack.c.bf16 %v567_v4, %v566_v2 }
 0x108   :  { %1116 = vst [vmem:[#allocation7 + $0x28] sm:$0xff] %v980_v5   ;;  %v487_v9 = vpop.f32.mrf.mxu2  ;;  %v527_v10 = vpop.f32.mrf.mxu3 }
 0x109   :  { %1124 = vst [vmem:[#allocation7 + $0x68] sm:$0xff] %v1020_v6   ;;  %v488_v11 = vadd.f32 %v1291_v42, %v487_v9  ;;  %v528_v12 = vadd.f32 %v1291_v42, %v527_v10  ;;  %v410_v13 = vpop.f32.mrf.mxu0  ;;  %v450_v14 = vpop.f32.mrf.mxu1 }
 0x10a   :  { %v411_v21 = vadd.f32 %v1291_v42, %v410_v13  ;;  %v451_v22 = vadd.f32 %v1291_v42, %v450_v14 }
 0x10b   :  { %v583_v17 = vmax.f32 %v488_v11, 0.0  ;;  %v599_v18 = vmax.f32 %v528_v12, 0.0 }
 0x10c   :  { %v552_v29 = vmax.f32 %v411_v21, 0.0  ;;  %v568_v30 = vmax.f32 %v451_v22, 0.0 }
 0x10d   :  { %v1060_v19 = vpack.c.bf16 %v583_v17, %v582_v15  ;;  %v1100_v20 = vpack.c.bf16 %v599_v18, %v598_v16 }
 0x10f   :  { %1132 = vst [vmem:[#allocation7 + $0xa8] sm:$0xff] %v1060_v19  }
 0x110   :  { %1140 = vst [vmem:[#allocation7 + $0xe8] sm:$0xff] %v1100_v20   ;;  %v490_v23 = vpop.f32.mrf.mxu2  ;;  %v530_v24 = vpop.f32.mrf.mxu3 }
 0x111   :  { %v412_v25 = vpop.f32.mrf.mxu0  ;;  %v452_v26 = vpop.f32.mrf.mxu1  ;;  %v491_v35 = vadd.f32 %v1291_v42, %v490_v23  ;;  %v531_v36 = vadd.f32 %v1291_v42, %v530_v24 }
 0x112   :  { %v413_v27 = vadd.f32 %v1291_v42, %v412_v25  ;;  %v453_v28 = vadd.f32 %v1291_v42, %v452_v26 }
 0x113   :  { %v584_v44 = vmax.f32 %v491_v35, 0.0  ;;  %v600_v45 = vmax.f32 %v531_v36, 0.0 }
 0x114   :  { %v553_v31 = vmax.f32 %v413_v27, 0.0  ;;  %v569_v32 = vmax.f32 %v453_v28, 0.0 }
 0x116   :  { %v985_v33 = vpack.c.bf16 %v553_v31, %v552_v29  ;;  %v1025_v34 = vpack.c.bf16 %v569_v32, %v568_v30 }
 0x118   :  { %1117 = vst [vmem:[#allocation7 + $0x30] sm:$0xff] %v985_v33   ;;  %v492_v37 = vpop.f32.mrf.mxu2  ;;  %v532_v38 = vpop.f32.mrf.mxu3 }
 0x119   :  { %1125 = vst [vmem:[#allocation7 + $0x70] sm:$0xff] %v1025_v34   ;;  %v493_v39 = vadd.f32 %v1291_v42, %v492_v37  ;;  %v533_v40 = vadd.f32 %v1291_v42, %v532_v38  ;;  %v415_v41 = vpop.f32.mrf.mxu0  ;;  %v455_v43 = vpop.f32.mrf.mxu1 }
 0x11a   :  { %v416_v50 = vadd.f32 %v1291_v42, %v415_v41  ;;  %v456_v51 = vadd.f32 %v1291_v42, %v455_v43 }
 0x11b   :  { %v585_v46 = vmax.f32 %v493_v39, 0.0  ;;  %v601_v47 = vmax.f32 %v533_v40, 0.0 }
 0x11c   :  { %v554_v58 = vmax.f32 %v416_v50, 0.0  ;;  %v570_v59 = vmax.f32 %v456_v51, 0.0 }
 0x11d   :  { %v1065_v48 = vpack.c.bf16 %v585_v46, %v584_v44  ;;  %v1105_v49 = vpack.c.bf16 %v601_v47, %v600_v45 }
 0x11f   :  { %1133 = vst [vmem:[#allocation7 + $0xb0] sm:$0xff] %v1065_v48  }
 0x120   :  { %1141 = vst [vmem:[#allocation7 + $0xf0] sm:$0xff] %v1105_v49   ;;  %v495_v52 = vpop.f32.mrf.mxu2  ;;  %v535_v53 = vpop.f32.mrf.mxu3 }
 0x121   :  { %v417_v54 = vpop.f32.mrf.mxu0  ;;  %v457_v55 = vpop.f32.mrf.mxu1  ;;  %v496_v0 = vadd.f32 %v1291_v42, %v495_v52  ;;  %v536_v1 = vadd.f32 %v1291_v42, %v535_v53 }
 0x122   :  { %v418_v56 = vadd.f32 %v1291_v42, %v417_v54  ;;  %v458_v57 = vadd.f32 %v1291_v42, %v457_v55 }
 0x123   :  { %v586_v6 = vmax.f32 %v496_v0, 0.0  ;;  %v602_v7 = vmax.f32 %v536_v1, 0.0 }
 0x124   :  { %v555_v60 = vmax.f32 %v418_v56, 0.0  ;;  %v571_v61 = vmax.f32 %v458_v57, 0.0 }
 0x126   :  { %v990_v62 = vpack.c.bf16 %v555_v60, %v554_v58  ;;  %v1030_v63 = vpack.c.bf16 %v571_v61, %v570_v59 }
 0x128   :  { %1118 = vst [vmem:[#allocation7 + $0x38] sm:$0xff] %v990_v62   ;;  %v497_v2 = vpop.f32.mrf.mxu2  ;;  %v537_v3 = vpop.f32.mrf.mxu3 }
 0x129   :  { %1126 = vst [vmem:[#allocation7 + $0x78] sm:$0xff] %v1030_v63   ;;  %v498_v4 = vadd.f32 %v1291_v42, %v497_v2  ;;  %v538_v5 = vadd.f32 %v1291_v42, %v537_v3 }
 0x12b   :  { %v587_v8 = vmax.f32 %v498_v4, 0.0  ;;  %v603_v9 = vmax.f32 %v538_v5, 0.0 }
 0x12d   :  { %v1070_v10 = vpack.c.bf16 %v587_v8, %v586_v6  ;;  %v1110_v11 = vpack.c.bf16 %v603_v9, %v602_v7 }
 0x12f   :  { %1134 = vst [vmem:[#allocation7 + $0xb8] sm:$0xff] %v1070_v10  }
 0x130   :  { %1142 = vst [vmem:[#allocation7 + $0xf8] sm:$0xff] %v1110_v11  }
 0x131   :  { %744 = dma.vmem_to_hbm [thread:$0]  %s737_s24, 4096, %s739_s27, [#allocation4], %s1252_s20, %s1252_s20, %s1253_s21  }
 0x132   :  { %1249 = dma.done.wait [#allocation4], 4096  }
 0x133   :  { %1250 = vsyncadd [#allocation4], 4294963200 }
 0x134   :  { %749 = vsyncpa [#allocation3], 1 }
 0x135   :  { %750 = vsyncpa [#allocation6], 1 }
 0x136   :  { %751 = vsyncpa [#allocation4], 1 }

</bundles_post_ra>
